<compile_context>
chip_gen: v6e
topology: v6e:2x2x1
jax: 0.10.0
libtpu: 0.0.40
codegen_flags: <defaults>
</compile_context>

<pallas_src>
import jax
import jax.numpy as jnp
from jax.experimental import pallas as pl
from jax.experimental.pallas import tpu as pltpu


def _round_up(a, b):
    return (a + b - 1) // b * b


def _cdiv(a, b):
    return (a + b - 1) // b


def rnn_cell_kernel(x_ref, h_ref, scale_ref, wh_ref, wx_ref, out_ref, newh_ref):
    """One tile of rows (TM, D).  Math in f32 regardless of streamed dtype.

    scale_ref : (1, D)     normal_scalar * n2n.weight[:, 0]
    wh_ref    : (D, 5*D)   [h2h.T | h2r.T | h2z.T | h2o.T | h2h.T @ w_out]
    wx_ref    : (D, 3*D)   diag(scale) @ [i2r.T | i2z.T | w_out]
                           with w_out = i2m.T @ m2m.T @ m2o.T
    """
    D = x_ref.shape[-1]
    x = x_ref[...].astype(jnp.float32)
    h = h_ref[...].astype(jnp.float32)

    # Two independent MXU passes (no serialized matmul chain).
    hcat = jnp.dot(h, wh_ref[...], preferred_element_type=jnp.float32)
    xcat = jnp.dot(x, wx_ref[...], preferred_element_type=jnp.float32)

    h2h_p = hcat[:, 0 * D:1 * D]
    h2r_p = hcat[:, 1 * D:2 * D]
    h2z_p = hcat[:, 2 * D:3 * D]
    h2o_p = hcat[:, 3 * D:4 * D]
    ho_p = hcat[:, 4 * D:5 * D]     # (h @ h2h.T) @ w_out

    i2r_p = xcat[:, 0 * D:1 * D]    # xs @ i2r.T
    i2z_p = xcat[:, 1 * D:2 * D]    # xs @ i2z.T
    xo_p = xcat[:, 2 * D:3 * D]     # xs @ w_out

    xs = x * scale_ref[...]          # x * n2n(normal)  (needed for newh)
    middle = xs + h2h_p

    # The module applies tanh to both "gates" (sigact is defined but unused).
    r = jnp.tanh(h2r_p + i2r_p)
    z = jnp.tanh(h2z_p + i2z_p)

    output = ho_p + xo_p + r * h2o_p          # m2o(m2m(i2m(middle))) + r*h2o(h)
    output = output + z * (h - output)        # == (1 - z) * output + z * h

    out_ref[...] = output.astype(out_ref.dtype)
    newh_ref[...] = jnp.tanh(middle).astype(newh_ref.dtype)


def init_params(input_size, hidden_size):
    # Deterministic initialization exactly as in Mymodel.__init__
    D, H = input_size, hidden_size
    eye = jnp.eye(D, dtype=jnp.float32)
    zD = jnp.zeros((D, D), jnp.float32)
    zH = jnp.zeros((H, H), jnp.float32)
    return {
        "i2m": eye, "m2m": eye, "m2o": eye,            # nn.init.eye_
        "n2n": jnp.ones((D, 1), jnp.float32),          # nn.init.ones_
        "h2h": zH,                                      # nn.init.zeros_
        "i2r": zD, "h2r": zH,
        "r2o": zH,                                      # defined but unused in forward
        "i2z": zD, "h2z": zH, "h2o": zH,
    }


def random_params(key, input_size, hidden_size):
    # Random weights (same shapes as the module) for a non-trivial correctness check.
    D, H = input_size, hidden_size
    ks = jax.random.split(key, 11)

    def w(k, o, i):
        return 0.1 * jax.random.normal(k, (o, i), dtype=jnp.float32)

    return {
        "i2m": w(ks[0], D, D), "m2m": w(ks[1], D, D), "m2o": w(ks[2], D, D),
        "n2n": w(ks[3], D, 1),
        "h2h": w(ks[4], H, H),
        "i2r": w(ks[5], D, D), "h2r": w(ks[6], H, H),
        "r2o": w(ks[7], H, H),
        "i2z": w(ks[8], D, D), "h2z": w(ks[9], H, H), "h2o": w(ks[10], H, H),
    }


def mymodel_forward(x, normal, hidden, params, tm_max=512):
    B, T, D = x.shape
    assert hidden.shape == x.shape, "forward requires input_size == hidden_size"
    M = B * T
    f32 = jnp.float32

    # Balanced row tiles; >= 2 grid steps when possible so v7x megacore can
    # shard the "parallel" axis (negligible cost on 1-TC v5e/v6e).
    n_steps = max(_cdiv(M, tm_max), 2 if M >= 16 else 1)
    TM = _round_up(_cdiv(M, n_steps), 8)
    grid = (_cdiv(M, TM),)

    # Free reshapes only — no pad / cast HBM passes over the streamed arrays.
    x2 = x.reshape(M, D)
    h2 = hidden.reshape(M, D)

    # Tiny per-call weight prep (D x kD), done in f32.
    def wT(name):
        return params[name].T.astype(f32)

    # scale = n2n(normal): (1, n) @ (1, D) requires normal to be a single
    # element, exactly like the module's nn.Linear(1, D).
    scale = normal.reshape(1, -1).astype(f32) @ params["n2n"].T.astype(f32)   # (1, D)
    w_out = wT("i2m") @ wT("m2m") @ wT("m2o")                                  # (D, D)
    w_h = jnp.concatenate(
        [wT("h2h"), wT("h2r"), wT("h2z"), wT("h2o"), wT("h2h") @ w_out], axis=1)   # (D, 5D)
    w_x = scale.reshape(-1, 1) * jnp.concatenate(
        [wT("i2r"), wT("i2z"), w_out], axis=1)                                      # (D, 3D)

    row_spec = pl.BlockSpec((TM, D), lambda i: (i, 0))

    def resident(shape):                     # VMEM-resident across grid steps
        return pl.BlockSpec(shape, lambda i: (0, 0))

    # TODO(synk): for very large D (>= ~768) the resident concatenated weights
    # (~8*D*D*4 B) should get a K/N tiling grid axis to stay inside v7x VMEM.
    out, newh = pl.pallas_call(
        rnn_cell_kernel,
        out_shape=(jax.ShapeDtypeStruct((M, D), x.dtype),
                   jax.ShapeDtypeStruct((M, D), hidden.dtype)),
        grid_spec=pltpu.PrefetchScalarGridSpec(
            num_scalar_prefetch=0,
            grid=grid,
            in_specs=[row_spec, row_spec,
                      resident((1, D)),
                      resident((D, 5 * D)),
                      resident((D, 3 * D))],
            out_specs=(row_spec, row_spec)),
        compiler_params=pltpu.CompilerParams(
            dimension_semantics=("parallel",)),
    )(x2, h2, scale, w_h, w_x)

    return out.reshape(B, T, D), newh.reshape(B, T, D)


def _reference(x, normal, hidden, p):
    # Pure-JAX transcription of the PyTorch forward (for correctness check).
    xs = x * (normal.reshape(1, 1, -1) @ p["n2n"].T)
    middle = xs + hidden @ p["h2h"].T
    output = ((middle @ p["i2m"].T) @ p["m2m"].T) @ p["m2o"].T
    r = jnp.tanh(hidden @ p["h2r"].T + xs @ p["i2r"].T)
    z = jnp.tanh(hidden @ p["h2z"].T + xs @ p["i2z"].T)
    output = output + r * (hidden @ p["h2o"].T)
    output = (1.0 - z) * output + z * hidden
    return output, jnp.tanh(middle)


if __name__ == "__main__":
    key = jax.random.PRNGKey(0)
    kx, kh, kn, kw = jax.random.split(key, 4)

    B, T, D = 2, 8, 32            # input_size == hidden_size == 32
    x = jax.random.normal(kx, (B, T, D), dtype=jnp.float32)
    hidden = jax.random.normal(kh, (B, T, D), dtype=jnp.float32)
    normal = jax.random.normal(kn, (1,), dtype=jnp.float32)

    forward = jax.jit(mymodel_forward)

    # Check 1: module's deterministic init (eye / ones / zeros).
    p0 = init_params(D, D)
    out0, newh0 = forward(x, normal, hidden, p0)
    jax.block_until_ready((out0, newh0))
    r_out0, r_newh0 = _reference(x, normal, hidden, p0)
    assert jnp.allclose(out0, r_out0, atol=1e-4, rtol=1e-4), "output mismatch (init params)"
    assert jnp.allclose(newh0, r_newh0, atol=1e-4, rtol=1e-4), "hidden mismatch (init params)"

    # Check 2: random weights to exercise the fused / concatenated matmul paths.
    p1 = random_params(kw, D, D)
    out1, newh1 = forward(x, normal, hidden, p1)
    jax.block_until_ready((out1, newh1))
    r_out1, r_newh1 = _reference(x, normal, hidden, p1)
    assert jnp.allclose(out1, r_out1, atol=1e-4, rtol=1e-4), "output mismatch (random params)"
    assert jnp.allclose(newh1, r_newh1, atol=1e-4, rtol=1e-4), "hidden mismatch (random params)"

    print("KERNEL_OK")
</pallas_src>

<mosaic_0001>
module attributes {stable_mosaic.version = 11 : i64} {
  func.func @rnn_cell_kernel(%arg0: i32, %arg1: memref<8x32xf32, #tpu.memory_space<vmem>>, %arg2: memref<8x32xf32, #tpu.memory_space<vmem>>, %arg3: memref<1x32xf32, #tpu.memory_space<vmem>>, %arg4: memref<32x160xf32, #tpu.memory_space<vmem>>, %arg5: memref<32x96xf32, #tpu.memory_space<vmem>>, %arg6: memref<8x32xf32, #tpu.memory_space<vmem>>, %arg7: memref<8x32xf32, #tpu.memory_space<vmem>>) attributes {dimension_semantics = [#tpu.dimension_semantics<parallel>], iteration_bounds = array<i64: 2>, scalar_prefetch = 0 : i64, scratch_operands = 0 : i64, tpu.core_type = #tpu.core_type<tc>, window_params = [{transform_indices = @transform_0, window_bounds = array<i64: 8, 32>}, {transform_indices = @transform_1, window_bounds = array<i64: 8, 32>}, {pipeline_mode = #tpu.pipeline_mode<synchronous>, transform_indices = @transform_2, window_bounds = array<i64: 1, 32>}, {pipeline_mode = #tpu.pipeline_mode<synchronous>, transform_indices = @transform_3, window_bounds = array<i64: 32, 160>}, {pipeline_mode = #tpu.pipeline_mode<synchronous>, transform_indices = @transform_4, window_bounds = array<i64: 32, 96>}, {transform_indices = @transform_5, window_bounds = array<i64: 8, 32>}, {transform_indices = @transform_6, window_bounds = array<i64: 8, 32>}]} {
    %c0 = arith.constant 0 : index
    %c0_0 = arith.constant 0 : index
    %0 = vector.load %arg1[%c0, %c0_0] : memref<8x32xf32, #tpu.memory_space<vmem>>, vector<8x32xf32>
    %c0_1 = arith.constant 0 : index
    %c0_2 = arith.constant 0 : index
    %1 = vector.load %arg2[%c0_1, %c0_2] : memref<8x32xf32, #tpu.memory_space<vmem>>, vector<8x32xf32>
    %c0_3 = arith.constant 0 : index
    %c0_4 = arith.constant 0 : index
    %2 = vector.load %arg4[%c0_3, %c0_4] : memref<32x160xf32, #tpu.memory_space<vmem>>, vector<32x160xf32>
    %cst = arith.constant dense<0.000000e+00> : vector<8x160xf32>
    %3 = tpu.matmul %1, %2, %cst {dimension_numbers = #tpu.dot_dimension_numbers<[1], [0], [0], [1], [0, 0, 1, 1], [], []>} : vector<8x32xf32>, vector<32x160xf32>, vector<8x160xf32> -> vector<8x160xf32>
    %c0_5 = arith.constant 0 : index
    %c0_6 = arith.constant 0 : index
    %4 = vector.load %arg5[%c0_5, %c0_6] : memref<32x96xf32, #tpu.memory_space<vmem>>, vector<32x96xf32>
    %cst_7 = arith.constant dense<0.000000e+00> : vector<8x96xf32>
    %5 = tpu.matmul %0, %4, %cst_7 {dimension_numbers = #tpu.dot_dimension_numbers<[1], [0], [0], [1], [0, 0, 1, 1], [], []>} : vector<8x32xf32>, vector<32x96xf32>, vector<8x96xf32> -> vector<8x96xf32>
    %6 = vector.extract_strided_slice %3 {offsets = [0, 0], sizes = [8, 32], strides = [1, 1]} : vector<8x160xf32> to vector<8x32xf32>
    %7 = vector.extract_strided_slice %3 {offsets = [0, 32], sizes = [8, 32], strides = [1, 1]} : vector<8x160xf32> to vector<8x32xf32>
    %8 = vector.extract_strided_slice %3 {offsets = [0, 64], sizes = [8, 32], strides = [1, 1]} : vector<8x160xf32> to vector<8x32xf32>
    %9 = vector.extract_strided_slice %3 {offsets = [0, 96], sizes = [8, 32], strides = [1, 1]} : vector<8x160xf32> to vector<8x32xf32>
    %10 = vector.extract_strided_slice %3 {offsets = [0, 128], sizes = [8, 32], strides = [1, 1]} : vector<8x160xf32> to vector<8x32xf32>
    %11 = vector.extract_strided_slice %5 {offsets = [0, 0], sizes = [8, 32], strides = [1, 1]} : vector<8x96xf32> to vector<8x32xf32>
    %12 = vector.extract_strided_slice %5 {offsets = [0, 32], sizes = [8, 32], strides = [1, 1]} : vector<8x96xf32> to vector<8x32xf32>
    %13 = vector.extract_strided_slice %5 {offsets = [0, 64], sizes = [8, 32], strides = [1, 1]} : vector<8x96xf32> to vector<8x32xf32>
    %c0_8 = arith.constant 0 : index
    %c0_9 = arith.constant 0 : index
    %14 = vector.load %arg3[%c0_8, %c0_9] : memref<1x32xf32, #tpu.memory_space<vmem>>, vector<1x32xf32>
    %15 = vector.broadcast %14 : vector<1x32xf32> to vector<8x32xf32>
    %16 = arith.mulf %0, %15 : vector<8x32xf32>
    %17 = arith.addf %16, %6 : vector<8x32xf32>
    %18 = arith.addf %7, %11 : vector<8x32xf32>
    %19 = math.tanh %18 : vector<8x32xf32>
    %20 = arith.addf %8, %12 : vector<8x32xf32>
    %21 = math.tanh %20 : vector<8x32xf32>
    %22 = arith.addf %10, %13 : vector<8x32xf32>
    %23 = arith.mulf %19, %9 : vector<8x32xf32>
    %24 = arith.addf %22, %23 : vector<8x32xf32>
    %25 = arith.subf %1, %24 : vector<8x32xf32>
    %26 = arith.mulf %21, %25 : vector<8x32xf32>
    %27 = arith.addf %24, %26 : vector<8x32xf32>
    %c0_10 = arith.constant 0 : index
    %c0_11 = arith.constant 0 : index
    %28 = vector.load %arg6[%c0_10, %c0_11] : memref<8x32xf32, #tpu.memory_space<vmem>>, vector<8x32xf32>
    tpu.vector_store %arg6[%c0_10, %c0_11], %27 {strides = array<i32>} : memref<8x32xf32, #tpu.memory_space<vmem>>, vector<8x32xf32>,
    %29 = math.tanh %17 : vector<8x32xf32>
    %c0_12 = arith.constant 0 : index
    %c0_13 = arith.constant 0 : index
    %30 = vector.load %arg7[%c0_12, %c0_13] : memref<8x32xf32, #tpu.memory_space<vmem>>, vector<8x32xf32>
    tpu.vector_store %arg7[%c0_12, %c0_13], %29 {strides = array<i32>} : memref<8x32xf32, #tpu.memory_space<vmem>>, vector<8x32xf32>,
    return
  }
  func.func @transform_0(%arg0: i32) -> (i32, i32) {
    %c0_i32 = arith.constant 0 : i32
    %c0_i32_0 = arith.constant 0 : i32
    return %arg0, %c0_i32 : i32, i32
  }
  func.func @transform_1(%arg0: i32) -> (i32, i32) {
    %c0_i32 = arith.constant 0 : i32
    %c0_i32_0 = arith.constant 0 : i32
    return %arg0, %c0_i32 : i32, i32
  }
  func.func @transform_2(%arg0: i32) -> (i32, i32) {
    %c0_i32 = arith.constant 0 : i32
    %c0_i32_0 = arith.constant 0 : i32
    %c0_i32_1 = arith.constant 0 : i32
    return %c0_i32, %c0_i32_0 : i32, i32
  }
  func.func @transform_3(%arg0: i32) -> (i32, i32) {
    %c0_i32 = arith.constant 0 : i32
    %c0_i32_0 = arith.constant 0 : i32
    %c0_i32_1 = arith.constant 0 : i32
    return %c0_i32, %c0_i32_0 : i32, i32
  }
  func.func @transform_4(%arg0: i32) -> (i32, i32) {
    %c0_i32 = arith.constant 0 : i32
    %c0_i32_0 = arith.constant 0 : i32
    %c0_i32_1 = arith.constant 0 : i32
    return %c0_i32, %c0_i32_0 : i32, i32
  }
  func.func @transform_5(%arg0: i32) -> (i32, i32) {
    %c0_i32 = arith.constant 0 : i32
    %c0_i32_0 = arith.constant 0 : i32
    return %arg0, %c0_i32 : i32, i32
  }
  func.func @transform_6(%arg0: i32) -> (i32, i32) {
    %c0_i32 = arith.constant 0 : i32
    %c0_i32_0 = arith.constant 0 : i32
    return %arg0, %c0_i32 : i32, i32
  }
}

</mosaic_0001>

<bundles_post_ra>
// kernel: mymodel_forward.1
= control target key start
LH: loop header
LB: loop body
LE: loop exit
PB: predicated region body
PF: predicated region fallthrough
CT: control target
= control target key end

     0   :  { %12 = vsyncpa [#allocation3], 0  ;;  %s1000_s0 = inlined_call_operand.vmem [shape: f32[16,32], index: 0, kind: input, shape index: {}]   ;;  %s1001_s1 = inlined_call_operand.vmem [shape: f32[16,32], index: 1, kind: input, shape index: {}]   ;;  %s1002_s2 = inlined_call_operand.vmem [shape: f32[1,32], index: 2, kind: input, shape index: {}]   ;;  %s1003_s3 = inlined_call_operand.vmem [shape: f32[32,160], index: 3, kind: input, shape index: {}]   ;;  %s1004_s4 = inlined_call_operand.vmem [shape: f32[32,96], index: 4, kind: input, shape index: {}]   ;;  %s1005_s5 = inlined_call_operand.hbm [shape: f32[16,32], index: 5, kind: output, shape index: {0}]   ;;  %s1006_s6 = inlined_call_operand.hbm [shape: f32[16,32], index: 6, kind: output, shape index: {1}]  }
   0x1   :  { %14 = vsyncpa [#allocation3 + $0x1], 0 }
   0x2   :  { %15 = vsyncpa [#allocation5], 0 }
   0x3   :  { %17 = vsyncpa [#allocation5 + $0x1], 0  ;;  %s835_s21 = smov 0   ;;  %s837_s22 = smov 0  }
   0x4   :  { %s839_s23 = smov 0   ;;  %s841_s24 = smov 0  }
   0x5 LB: > { %s856_s25 = sadd.s32 4294967295, %s791_s24   ;;  %s615_s26 = sadd.s32 4294967294, %s791_s24   ;;  %s791_s24 = sphi %s841_s24, %s1016_s24   ;;  %s787_s23 = sphi %s839_s23, %s1015_s23   ;;  %s783_s22 = sphi %s837_s22, %s1014_s22   ;;  %s779_s21 = sphi %s835_s21, %s1013_s21  }
   0x6   : > { %s860_s27 = sadd.s32 1, %s791_s24   ;;  %s145_s28 = sadd.s32 1, %s787_s23 }
   0x7   : > { %s142_s29 = ssub.s32 %s791_s24, %s860_s27  ;;  %p155_p0 = scmp.ne.s32.totalorder %s787_s23, %s783_s22 }
   0x8   : > { %p143_p1 = scmp.eq.s32.totalorder %s142_s29, 0  ;;  %p156_p2 = scmp.eq.s32.totalorder %s856_s25, 1 }
   0x9   : > { %p161_p3 = scmp.ne.s32.totalorder %s783_s22, %s779_s21  ;;  %p162_p4 = scmp.eq.s32.totalorder %s615_s26, 1 }
   0xa   : > { %s871_s30 = scalar_select %p143_p1, %s787_s23, %s145_s28  }
   0xb   : > { %p873_p5 = por %p156_p2, %p155_p0  ;;  %p877_p6 = por %p162_p4, %p161_p3 }
   0xc   : > { %p618_p7 = scmp.ge.s32.totalorder %s791_s24, 1  ;;  %p229_p8 = scmp.lt.s32.totalorder %s791_s24, 3 }
   0xe   : > { %p230_p9 = pnand %p618_p7, %p229_p8 }
   0xf   : > { %p267_p10 = scmp.lt.s32.totalorder (!%p230_p9), %s856_s25, 1  ;;  %s795_s13 = smov (!%p230_p9), 64  }
  0x10   : > { %233 = sbr.rel (%p230_p9) target bundleno = 722 (0x2d2), region = 40  ;;  %s796_s14 = smov (!%p230_p9), 32  }
  0x11   : > { %s935_s16 = sand.u32 (!%p230_p9), 1, %s783_s22   ;;  %s1007_s20 = sshll.u32 (!%p230_p9), %s856_s25, 7 }
  0x12   : > { %s1008_s17 = sshll.u32 (!%p230_p9), %s935_s16, 3  ;;  %s510_s28 = scalar_lea.hbm (!%p230_p9), %s1006_s6, %s1007_s20 }
  0x13   : > { %s266_s18 = scalar_lea.vmem (!%p230_p9), [#allocation4], %s1008_s17  ;;  %s486_s9 = scalar_lea.sflag (!%p230_p9), [#allocation5], %s935_s16 }
  0x15   : > { %v363_v0 = vld [vmem:[%s1004_s4 + $0x18] sm:$0xff]  ;;  %v793_v1 = vmov 0.0   ;;  %v362_v2 = vld [vmem:[%s1004_s4 + $0x10] sm:$0xff]  ;;  %vm794_vm0 = vmmov 0   ;;  %s268_s15 = scalar_select %p267_p10, %s856_s25, 1  ;;  %v282_v5 = vld [vmem:[%s1003_s3 + $0x28] sm:$0xff] }
  0x16   : > { %637 = vmatprep.subr.mxu1 %v793_v1  ;;  %645 = vmatprep.mubr.msk.f32.mxu1 %vm794_vm0, %v793_v1  ;;  %v284_v3 = vld [vmem:[%s1003_s3 + $0x38] sm:$0xff]  ;;  %v283_v4 = vld [vmem:[%s1003_s3 + $0x30] sm:$0xff]  ;;  %v281_v6 = vld [vmem:[%s1003_s3 + $0x20] sm:$0xff]  ;;  %vm285_vm1 = vcmask 261120  }
  0x17   : > { %638 = vmatpush3.msra.mxu1 %v363_v0  ;;  %313 = vmatprep.subr.mxu0 %v284_v3  ;;  %v361_v7 = vld [vmem:[%s1004_s4 + $0x8] sm:$0xff]  ;;  %v280_v8 = vld [vmem:[%s1003_s3 + $0x18] sm:$0xff]  ;;  %s621_s11 = sshll.u32 %s268_s15, 3  ;;  %v279_v9 = vld [vmem:[%s1003_s3 + $0x10] sm:$0xff] }
  0x18   : > { %639 = vmatprep.subr.mxu1 %v793_v1  ;;  %314 = vmatpush1.msra.mxu0 %v283_v4  ;;  %v360_v10 = vld [vmem:[%s1004_s4] sm:$0xff]  ;;  %s270_s19 = scalar_lea.vmem %s1000_s0, %s621_s11  ;;  %v278_v11 = vld [vmem:[%s1003_s3 + $0x8] sm:$0xff]  ;;  %s274_s29 = scalar_lea.vmem %s1001_s1, %s621_s11 }
  0x19   : > { %640 = vmatpush3.msra.mxu1 %v362_v2  ;;  %315 = vmatprep.subr.mxu0 %v282_v5  ;;  %v275_v12 = vld [vmem:[%s270_s19] sm:$0xff]  ;;  %s797_s19 = smov 96   ;;  %s798_s11 = smov [#allocation4]  }
  0x1a   : > { %641 = vmatprep.subr.mxu1 %v793_v1  ;;  %316 = vmatpush1.msra.mxu0 %v281_v6  ;;  %v277_v13 = vld [vmem:[%s1003_s3] sm:$0xff]  ;;  %s705_s12 = sshll.u32 %s798_s11, 4  ;;  %s706_s12 = int_to_ptr.vmem [resolvable:$false] %s705_s12 }
  0x1b   : > { %642 = vmatpush3.msra.mxu1 %v361_v7  ;;  %317 = vmatprep.subr.mxu0 %v280_v8  ;;  %v276_v14 = vld [vmem:[%s274_s29] sm:$0xff]  ;;  %s512_s29 = sshll.u32 %s266_s18, 4  ;;  %s513_s29 = int_to_ptr.vmem [resolvable:$true] %s512_s29 }
  0x1c   : > { %643 = vmatprep.subr.mxu1 %v793_v1  ;;  %318 = vmatpush1.msra.mxu0 %v279_v9  ;;  %v625_v15 = vld [vmem:[%s1002_s2] ss:$0 sm:$0xff]  ;;  %s701_s10 = scalar_lea.vmem %s513_s29, 128  ;;  %p708_p0 = scmp.lt.s32.totalorder %s513_s29, %s706_s12 }
  0x1d   : > { %644 = vmatpush3.msra.mxu1 %v360_v10  ;;  %319 = vmatprep.subr.mxu0 %v278_v11  ;;  %v444_v16 = vmul.f32 %v625_v15, %v275_v12  ;;  %p702_p11 = scmp.ne.s32.totalorder %s513_s29, %s701_s10 }
  0x1e   : > { %646 = vmatmul.mubr.msk.f32.vlgmr.msra.gmra.mxu1 %vm285_vm1, %v275_v12  ;;  %320 = vmatpush1.msra.mxu0 %v277_v13 }
  0x1f   : > { %353 = vmatprep.mubr.f32.mxu0 %v793_v1  ;;  %p703_p12 = pnand %p702_p11, %p873_p5 }
  0x20   : > { %623 = vmatmul.mubr.msk.f32.vlgmr.msra.gmra.mxu0 %vm285_vm1, %v276_v14 }
  0x21   : > { %p704_p13 = pneg %p703_p12 }
  0xde   : > { %v433_v17 = vpop.f32.mrf.mxu1 }
  0xdf   : > { %452 = vrot.lane.b32.xlu1 %v433_v17, %s795_s13  ;;  %447 = vrot.lane.b32.xlu0 %v433_v17, %s796_s14  ;;  %s707_s14 = scalar_lea.vmem %s706_s12, 256 }
  0xe0   : > { %v647_v18 = vpop.f32.mrf.mxu1  ;;  %v355_v19 = vpop.f32.mrf.mxu0  ;;  %p709_p1 = scmp.lt.s32.totalorder %s707_s14, %s701_s10 }
  0xe1   : > { %v445_v20 = vadd.f32 %v444_v16, %v355_v19 }
  0xe2   : > { %v357_v28 = vpop.f32.mrf.mxu0  ;;  %p710_p2 = por %p709_p1, %p708_p0 }
  0xe3   : > { %697 = vtanh.f32 %v445_v20  ;;  %457 = vrot.lane.b32.xlu0 %v355_v19, %s795_s13 }
  0xe4   : > { %p711_p3 = pnand %p710_p2, %p704_p13 }
  0xf0   : > { %v698_v21 = vpop.eup %697 }
  0xf1   : > { %479 = vst.msk [vmem:[%s266_s18] sm:$0xff] %vm285_vm1, %v698_v21 }
 0x151   : > { %v448_v22 = vpop.permute.xlu0 %447  ;;  %v453_v27 = vpop.permute.xlu1 %452 }
 0x152   : > { %v450_v23 = vadd.f32 %v448_v22, %v355_v19  ;;  %v455_v29 = vadd.f32 %v453_v27, %v357_v28 }
 0x154   : > { %699 = vtanh.f32 %v450_v23 }
 0x155   : > { %v458_v24 = vpop.permute.xlu0 %457 }
 0x161   : > { %v700_v25 = vpop.eup %699 }
 0x162   : > { %v460_v26 = vmul.f32 %v700_v25, %v458_v24 }
 0x164   : > { %462 = vrot.lane.b32.xlu1 %v460_v26, %s797_s19 }
 0x1d6   : > { %v463_v30 = vpop.permute.xlu1 %462 }
 0x1d7   : > { %v465_v31 = vadd.f32 %v463_v30, %v455_v29 }
 0x1d9   : > { %v466_v32 = vsub.f32 %v276_v14, %v465_v31 }
 0x1db   : > { %468 = vrot.lane.b32.xlu0 %v466_v32, %s795_s13 }
 0x1dc   : > { %714 = shalt.err (!%p711_p3)
}
 0x1dd   : > { %s715_s19 = scalar_lea.hbm %s510_s28, 128  ;;  %s719_s15 = scalar_lea.hbm %s1006_s6, 256 }
 0x1de   : > { %p716_p4 = scmp.ne.s32.totalorder %s510_s28, %s715_s19  ;;  %p720_p9 = scmp.lt.s32.totalorder %s510_s28, %s1006_s6 }
 0x1df   : > { %p721_p10 = scmp.lt.s32.totalorder %s719_s15, %s715_s19 }
 0x1e0   : > { %p717_p7 = pnand %p716_p4, %p873_p5 }
 0x1e1   : > { %p722_p11 = por %p721_p10, %p720_p9 }
 0x1e2   : > { %p718_p8 = pneg %p717_p7 }
 0x1e4   : > { %p723_p12 = pnand %p722_p11, %p718_p8 }
 0x1e6   : > { %726 = shalt.err (!%p723_p12)
}
 0x1e7   : > { %649 = dma.vmem_to_hbm [thread:$0]  (%p873_p5), %s513_s29, 128, %s510_s28, %s486_s9  }
 0x1e8   : > { %s1011_s10 = sshll.u32 %s935_s16, 3  ;;  %s1012_s17 = sshll.u32 %s856_s25, 7 }
 0x1e9   : > { %s259_s11 = scalar_lea.vmem [#allocation2], %s1011_s10  ;;  %s497_s19 = scalar_lea.hbm %s1005_s5, %s1012_s17 }
 0x1ea   : > { %s499_s12 = sshll.u32 %s259_s11, 4  ;;  %s481_s18 = scalar_lea.sflag [#allocation3], %s935_s16  ;;  %s500_s12 = int_to_ptr.vmem [resolvable:$true] %s499_s12 }
 0x1eb   : > { %s727_s26 = scalar_lea.vmem %s500_s12, 128 }
 0x1ec   : > { %p728_p13 = scmp.ne.s32.totalorder %s500_s12, %s727_s26 }
 0x1ee   : > { %p729_p0 = pnand %p728_p13, %p873_p5 }
 0x1f0   : > { %p730_p1 = pneg %p729_p0 }
 0x24d   : > { %v469_v33 = vpop.permute.xlu0 %468 }
 0x24e   : > { %v471_v34 = vmul.f32 %v700_v25, %v469_v33 }
 0x250   : > { %473 = vrot.lane.b32.xlu1 %v471_v34, %s795_s13  ;;  %s799_s13 = smov [#allocation2]  }
 0x251   : > { %s731_s28 = sshll.u32 %s799_s13, 4  ;;  %s732_s28 = int_to_ptr.vmem [resolvable:$false] %s731_s28 }
 0x252   : > { %s733_s29 = scalar_lea.vmem %s732_s28, 256  ;;  %p734_p2 = scmp.lt.s32.totalorder %s500_s12, %s732_s28 }
 0x253   : > { %p735_p3 = scmp.lt.s32.totalorder %s733_s29, %s727_s26 }
 0x255   : > { %p736_p4 = por %p735_p3, %p734_p2 }
 0x257   : > { %p737_p7 = pnand %p736_p4, %p730_p1 }
 0x2c2   : > { %v474_v35 = vpop.permute.xlu1 %473 }
 0x2c3   : > { %v476_v36 = vadd.f32 %v474_v35, %v465_v31 }
 0x2c5   : > { %477 = vst.msk [vmem:[%s259_s11] sm:$0xff] %vm285_vm1, %v476_v36 }
 0x2c6   : > { %740 = shalt.err (!%p737_p7)
}
 0x2c7   : > { %s741_s25 = scalar_lea.hbm %s497_s19, 128  ;;  %s745_s15 = scalar_lea.hbm %s1005_s5, 256 }
 0x2c8   : > { %p742_p8 = scmp.ne.s32.totalorder %s497_s19, %s741_s25  ;;  %p746_p11 = scmp.lt.s32.totalorder %s497_s19, %s1005_s5 }
 0x2c9   : > { %p747_p12 = scmp.lt.s32.totalorder %s745_s15, %s741_s25 }
 0x2ca   : > { %p743_p9 = pnand %p742_p8, %p873_p5 }
 0x2cb   : > { %p748_p13 = por %p747_p12, %p746_p11 }
 0x2cc   : > { %p744_p10 = pneg %p743_p9 }
 0x2ce   : > { %p749_p0 = pnand %p748_p13, %p744_p10 }
 0x2d0   : > { %752 = shalt.err (!%p749_p0)
}
 0x2d1   : > { %648 = dma.vmem_to_hbm [thread:$0]  (%p873_p5), %s500_s12, 128, %s497_s19, %s481_s18  }
 0x2d2 PF: > { %p659_p1 = scmp.ge.s32.totalorder %s791_s24, 2  ;;  %s524_s17 = sand.u32 1, %s779_s21  }
 0x2d3   : > { %s525_s20 = scalar_lea.sflag [#allocation3], %s524_s17 }
 0x2d4   : > { %p653_p2 = pnand %p659_p1, %p877_p6 }
 0x2d6   : > { %p654_p3 = pneg %p653_p2 }
 0x2d8   : > { %770 = dma.done.wait (%p654_p3), %s525_s20, 128  }
 0x2d9   : > { %772 = vsyncadd (%p654_p3), %s525_s20, 4294967168  ;;  %s534_s14 = scalar_lea.sflag [#allocation5], %s524_s17 }
 0x2da   : > { %774 = dma.done.wait (%p654_p3), %s534_s14, 128  }
 0x2db   : > { %776 = vsyncadd (%p654_p3), %s534_s14, 4294967168  ;;  %p20_p5 = scmp.ge.s32.totalorder %s860_s27, 4   ;;  %s1013_s21 = smov %s783_s22 }
 0x2dc   : > { %s1014_s22 = smov %s787_s23  ;;  %s1015_s23 = smov %s871_s30 }
 0x2dd   : > { %s1016_s24 = smov %s860_s27  ;;  %22 = sbr.rel (!%p20_p5) target bundleno = 5 (0x5), region = 95 }
 0x2e2   :  { %539 = vsyncpa [#allocation3], 1 }
 0x2e3   :  { %541 = vsyncpa [#allocation3 + $0x1], 1 }
 0x2e4   :  { %542 = vsyncpa [#allocation5], 1 }
 0x2e5   :  { %544 = vsyncpa [#allocation5 + $0x1], 1 }

</bundles_post_ra>
